<compile_context>
chip_gen: v7x
topology: tpu7x:2x2x1
jax: 0.10.0
libtpu: 0.0.40
codegen_flags: <defaults>
</compile_context>

<pallas_src>
import functools

import jax
import jax.numpy as jnp
from jax import lax
from jax.experimental import pallas as pl
from jax.experimental.pallas import tpu as pltpu

LANES = 128
SUBLANES = 8


def _round_up(x, m):
    return (x + m - 1) // m * m


def _device_kind():
    try:
        return jax.devices()[0].device_kind.lower()
    except Exception:
        return ""


def _pick_k(row_tile):
    """Largest K in {8,4,2,1} such that row_tile is a multiple of 8*K."""
    for k in (8, 4, 2, 1):
        if row_tile % (SUBLANES * k) == 0:
            return k
    return 1


def _pow_int(base, n):
    """base ** n for small positive integer n via binary exponentiation (VPU only)."""
    result = None
    b = base
    while n:
        if n & 1:
            result = b if result is None else result * b
        n >>= 1
        if n:
            b = b * b
    return result


def _pow_term(delta, gamma):
    """delta ** gamma, avoiding exp/log on the EUP for common gammas."""
    g = float(gamma)
    if g == 0.0:
        return jnp.ones_like(delta)
    if g == int(g) and 0 < int(g) <= 8:
        return _pow_int(delta, int(g))
    if 2.0 * g == int(2.0 * g) and 0 < g <= 8:
        # Half-integer: delta**g = sqrt(delta) ** (2g)  (sqrt is one EUP op).
        return _pow_int(jnp.sqrt(delta), int(2.0 * g))
    return jnp.power(delta, g)


def _hsm_kernel(x_ref, t_ref, o_ref, acc_ref, *, beta, gamma, row_tile,
                blocks_per_core, total_blocks, valid_rows_last, k_split,
                need_tail_mask, need_range_guard):
    c = pl.program_id(0)   # core / partial-sum index
    i = pl.program_id(1)   # row-block index within this core's range (sequential)

    @pl.when(i == 0)
    def _():
        acc_ref[c] = jnp.zeros((k_split, SUBLANES, LANES), jnp.float32)

    # Cast on the VPU inside the kernel (keeps HBM traffic at native width).
    x = x_ref[...].astype(jnp.float32)
    t = t_ref[...].astype(jnp.float32)
    delta = jnp.abs(x - t)
    loss = (1.0 - jnp.exp(-beta * delta)) * _pow_term(delta, gamma)

    def accumulate(vals):
        # K independent (8,128) partial sums -> no long serial add chain.
        partial = vals.reshape(row_tile // (SUBLANES * k_split), k_split,
                               SUBLANES, LANES).sum(axis=0)
        acc_ref[c] = acc_ref[c] + partial

    if need_tail_mask:
        block_idx = c * blocks_per_core + i
        is_tail = block_idx == (total_blocks - 1)

        @pl.when(is_tail)
        def _():
            # Only the block containing the ragged row tail pays for the mask.
            row = lax.broadcasted_iota(jnp.int32, (row_tile, LANES), 0)
            accumulate(jnp.where(row < valid_rows_last, loss, 0.0))

        if need_range_guard:
            not_tail = block_idx < (total_blocks - 1)
        else:
            not_tail = jnp.logical_not(is_tail)

        @pl.when(not_tail)
        def _():
            accumulate(loss)
    elif need_range_guard:
        block_idx = c * blocks_per_core + i

        @pl.when(block_idx < total_blocks)
        def _():
            accumulate(loss)
    else:
        accumulate(loss)

    @pl.when(i == pl.num_programs(1) - 1)
    def _():
        o_ref[0, 0] = jnp.sum(acc_ref[c])


def hsm_loss(inp, target, beta=1.0, gamma=2.0):
    assert inp.shape == target.shape
    n_elems = int(inp.size)
    beta = float(beta)
    gamma = float(gamma)

    x_flat = inp.reshape(-1)
    t_flat = target.reshape(-1)

    rows = n_elems // LANES
    n_main = rows * LANES

    # <=127-element ragged tail: tiny plain-JAX epilogue (avoids a full-array
    # jnp.pad copy just to append <128 zeros).
    tail_sum = jnp.float32(0.0)
    if n_main != n_elems:
        xt = x_flat[n_main:].astype(jnp.float32)
        tt = t_flat[n_main:].astype(jnp.float32)
        d = jnp.abs(xt - tt)
        tail_sum = jnp.sum((1.0 - jnp.exp(-beta * d)) * _pow_term(d, gamma))

    if rows == 0:
        return tail_sum / n_elems

    if n_main == n_elems:
        x2 = x_flat.reshape(rows, LANES)
        t2 = t_flat.reshape(rows, LANES)
    else:
        x2 = x_flat[:n_main].reshape(rows, LANES)
        t2 = t_flat[:n_main].reshape(rows, LANES)

    # Generation-dependent knobs.
    kind = _device_kind()
    ncores = 2 if "v7" in kind else 1                     # v5e/v6e are 1 TC/chip
    if ("v6" in kind) or ("v7" in kind):
        block_bytes = 4 * 1024 * 1024                     # 2 in x 2 bufs x 4 MiB = 16 MiB
        vmem_limit = 40 * 1024 * 1024                     # headroom; < 64 MiB physical (v7x)
    else:
        block_bytes = 2 * 1024 * 1024                     # fits v5e 16 MiB scoped default
        vmem_limit = None

    itemsize = jnp.dtype(inp.dtype).itemsize
    desired = max(SUBLANES,
                  (block_bytes // (LANES * itemsize)) // SUBLANES * SUBLANES)
    row_tile = int(min(desired, _round_up(rows, SUBLANES)))

    total_blocks = int(pl.cdiv(rows, row_tile))
    blocks_per_core = int(pl.cdiv(total_blocks, ncores))
    valid_rows_last = int(rows - (total_blocks - 1) * row_tile)
    need_tail_mask = valid_rows_last < row_tile
    need_range_guard = (ncores * blocks_per_core) != total_blocks
    k_split = _pick_k(row_tile)

    if need_range_guard:
        def in_map(c, i):
            # Clamp so fully out-of-range logical blocks read a valid tile
            # (their accumulation is skipped in-kernel).
            return (jnp.minimum(c * blocks_per_core + i, total_blocks - 1), 0)
    else:
        def in_map(c, i):
            return (c * blocks_per_core + i, 0)

    kernel = functools.partial(
        _hsm_kernel,
        beta=beta, gamma=gamma, row_tile=row_tile,
        blocks_per_core=blocks_per_core, total_blocks=total_blocks,
        valid_rows_last=valid_rows_last, k_split=k_split,
        need_tail_mask=bool(need_tail_mask),
        need_range_guard=bool(need_range_guard))

    cost = pl.CostEstimate(flops=8 * n_main, transcendentals=n_main,
                           bytes_accessed=2 * n_main * itemsize)

    def run(dim_sem):
        return pl.pallas_call(
            kernel,
            out_shape=jax.ShapeDtypeStruct((ncores, 1), jnp.float32),
            grid_spec=pltpu.PrefetchScalarGridSpec(
                num_scalar_prefetch=0,
                grid=(ncores, blocks_per_core),
                in_specs=[
                    pl.BlockSpec((row_tile, LANES), in_map),
                    pl.BlockSpec((row_tile, LANES), in_map),
                ],
                out_specs=pl.BlockSpec((1, 1), lambda c, i: (c, 0),
                                       memory_space=pltpu.SMEM),
                scratch_shapes=[
                    pltpu.VMEM((ncores, k_split, SUBLANES, LANES), jnp.float32)],
            ),
            compiler_params=pltpu.CompilerParams(
                dimension_semantics=dim_sem,
                vmem_limit_bytes=vmem_limit),
            cost_estimate=cost,
        )(x2, t2)

    if ncores > 1:
        # v7x: explicitly shard the leading axis across the two TensorCores.
        try:
            partials = jax.block_until_ready(
                run((pltpu.CORE_PARALLEL, pltpu.ARBITRARY)))
        except Exception:
            partials = run((pltpu.PARALLEL, pltpu.ARBITRARY))
    else:
        partials = run((pltpu.ARBITRARY, pltpu.ARBITRARY))

    return (jnp.sum(partials) + tail_sum) / n_elems


def hsm_loss_ref(inp, target, beta=1.0, gamma=2.0):
    delta = jnp.abs(inp.astype(jnp.float32) - target.astype(jnp.float32))
    return jnp.mean((1.0 - jnp.exp(-beta * delta)) * jnp.power(delta, gamma))


if __name__ == "__main__":
    beta, gamma = 1.0, 2.0  # module hyperparameters

    key = jax.random.PRNGKey(0)
    k1, k2 = jax.random.split(key)
    # NCHW heatmap-like inputs, small shapes (128-divisible path).
    x = jax.random.uniform(k1, (2, 4, 16, 16), dtype=jnp.float32)
    t = jax.random.uniform(k2, (2, 4, 16, 16), dtype=jnp.float32)

    out = jax.block_until_ready(hsm_loss(x, t, beta=beta, gamma=gamma))
    ref = hsm_loss_ref(x, t, beta=beta, gamma=gamma)
    assert jnp.allclose(out, ref, rtol=1e-5, atol=1e-6), (out, ref)

    # Also exercise the ragged (non-128-divisible) path: row-tail mask + JAX tail.
    k3, k4 = jax.random.split(k2)
    xr = jax.random.uniform(k3, (3, 5, 7, 11), dtype=jnp.float32)
    tr = jax.random.uniform(k4, (3, 5, 7, 11), dtype=jnp.float32)
    out_r = jax.block_until_ready(hsm_loss(xr, tr, beta=beta, gamma=gamma))
    ref_r = hsm_loss_ref(xr, tr, beta=beta, gamma=gamma)
    assert jnp.allclose(out_r, ref_r, rtol=1e-5, atol=1e-6), (out_r, ref_r)

    print("KERNEL_OK")
</pallas_src>

<mosaic_0001>
module attributes {stable_mosaic.version = 11 : i64} {
  func.func @_hsm_kernel(%arg0: i32, %arg1: i32, %arg2: memref<16x128xf32, #tpu.memory_space<vmem>>, %arg3: memref<16x128xf32, #tpu.memory_space<vmem>>, %arg4: memref<1x1xf32, #tpu.memory_space<smem>>, %arg5: memref<1x2x8x128xf32, #tpu.memory_space<vmem>>) attributes {dimension_semantics = [#tpu.dimension_semantics<arbitrary>, #tpu.dimension_semantics<arbitrary>], iteration_bounds = array<i64: 1, 1>, scalar_prefetch = 0 : i64, scratch_operands = 1 : i64, tpu.core_type = #tpu.core_type<tc>, window_params = [{transform_indices = @transform_0, window_bounds = array<i64: 16, 128>}, {transform_indices = @transform_1, window_bounds = array<i64: 16, 128>}, {transform_indices = @transform_2, window_bounds = array<i64: 1, 1>}]} {
    %c0_i32 = arith.constant 0 : i32
    %0 = arith.cmpi eq, %arg1, %c0_i32 : i32
    %1 = arith.extui %0 : i1 to i32
    %c0_i32_0 = arith.constant 0 : i32
    %2 = arith.cmpi ne, %1, %c0_i32_0 : i32
    scf.if %2 {
      %cst_14 = arith.constant 0.000000e+00 : f32
      %27 = vector.broadcast %cst_14 : f32 to vector<2x8x128xf32>
      %28 = arith.index_cast %arg0 : i32 to index
      %c0_15 = arith.constant 0 : index
      %c0_16 = arith.constant 0 : index
      %c0_17 = arith.constant 0 : index
      %29 = vector.load %arg5[%28, %c0_15, %c0_16, %c0_17] : memref<1x2x8x128xf32, #tpu.memory_space<vmem>>, vector<1x2x8x128xf32>
      %30 = vector.shape_cast %29 : vector<1x2x8x128xf32> to vector<2x8x128xf32>
      %31 = vector.shape_cast %27 : vector<2x8x128xf32> to vector<1x2x8x128xf32>
      tpu.vector_store %arg5[%28, %c0_15, %c0_16, %c0_17], %31 {strides = array<i32>} : memref<1x2x8x128xf32, #tpu.memory_space<vmem>>, vector<1x2x8x128xf32>,
    } else {
    }
    %c0 = arith.constant 0 : index
    %c0_1 = arith.constant 0 : index
    %3 = vector.load %arg2[%c0, %c0_1] : memref<16x128xf32, #tpu.memory_space<vmem>>, vector<16x128xf32>
    %c0_2 = arith.constant 0 : index
    %c0_3 = arith.constant 0 : index
    %4 = vector.load %arg3[%c0_2, %c0_3] : memref<16x128xf32, #tpu.memory_space<vmem>>, vector<16x128xf32>
    %5 = arith.subf %3, %4 : vector<16x128xf32>
    %6 = math.absf %5 : vector<16x128xf32>
    %cst = arith.constant -1.000000e+00 : f32
    %7 = vector.broadcast %cst : f32 to vector<16x128xf32>
    %8 = arith.mulf %7, %6 : vector<16x128xf32>
    %9 = math.exp %8 : vector<16x128xf32>
    %cst_4 = arith.constant 1.000000e+00 : f32
    %10 = vector.broadcast %cst_4 : f32 to vector<16x128xf32>
    %11 = arith.subf %10, %9 : vector<16x128xf32>
    %12 = arith.mulf %6, %6 : vector<16x128xf32>
    %13 = arith.mulf %11, %12 : vector<16x128xf32>
    %14 = vector.shape_cast %13 : vector<16x128xf32> to vector<1x2x8x128xf32>
    %cst_5 = arith.constant dense<0.000000e+00> : vector<2x8x128xf32>
    %15 = vector.multi_reduction <add>, %14, %cst_5 [0] : vector<1x2x8x128xf32> to vector<2x8x128xf32>
    %16 = arith.index_cast %arg0 : i32 to index
    %c0_6 = arith.constant 0 : index
    %c0_7 = arith.constant 0 : index
    %c0_8 = arith.constant 0 : index
    %17 = vector.load %arg5[%16, %c0_6, %c0_7, %c0_8] : memref<1x2x8x128xf32, #tpu.memory_space<vmem>>, vector<1x2x8x128xf32>
    %18 = vector.shape_cast %17 : vector<1x2x8x128xf32> to vector<2x8x128xf32>
    %19 = arith.addf %18, %15 : vector<2x8x128xf32>
    %20 = arith.index_cast %arg0 : i32 to index
    %c0_9 = arith.constant 0 : index
    %c0_10 = arith.constant 0 : index
    %c0_11 = arith.constant 0 : index
    %21 = vector.load %arg5[%20, %c0_9, %c0_10, %c0_11] : memref<1x2x8x128xf32, #tpu.memory_space<vmem>>, vector<1x2x8x128xf32>
    %22 = vector.shape_cast %21 : vector<1x2x8x128xf32> to vector<2x8x128xf32>
    %23 = vector.shape_cast %19 : vector<2x8x128xf32> to vector<1x2x8x128xf32>
    tpu.vector_store %arg5[%20, %c0_9, %c0_10, %c0_11], %23 {strides = array<i32>} : memref<1x2x8x128xf32, #tpu.memory_space<vmem>>, vector<1x2x8x128xf32>,
    %c0_i32_12 = arith.constant 0 : i32
    %24 = arith.cmpi eq, %arg1, %c0_i32_12 : i32
    %25 = arith.extui %24 : i1 to i32
    %c0_i32_13 = arith.constant 0 : i32
    %26 = arith.cmpi ne, %25, %c0_i32_13 : i32
    scf.if %26 {
      %27 = arith.index_cast %arg0 : i32 to index
      %c0_14 = arith.constant 0 : index
      %c0_15 = arith.constant 0 : index
      %c0_16 = arith.constant 0 : index
      %28 = vector.load %arg5[%27, %c0_14, %c0_15, %c0_16] : memref<1x2x8x128xf32, #tpu.memory_space<vmem>>, vector<1x2x8x128xf32>
      %29 = vector.shape_cast %28 : vector<1x2x8x128xf32> to vector<2x8x128xf32>
      %30 = vector.shape_cast %29 : vector<2x8x128xf32> to vector<1x2x8x128xf32>
      %cst_17 = arith.constant dense<0.000000e+00> : vector<1xf32>
      %31 = vector.multi_reduction <add>, %30, %cst_17 [1, 2, 3] : vector<1x2x8x128xf32> to vector<1xf32>
      %32 = vector.shape_cast %31 : vector<1xf32> to vector<1x1x1x1xf32>
      %33 = vector.extract %32[0, 0, 0, 0] : f32 from vector<1x1x1x1xf32>
      %c0_18 = arith.constant 0 : index
      %c0_19 = arith.constant 0 : index
      %34 = memref.load %arg4[%c0_18, %c0_19] : memref<1x1xf32, #tpu.memory_space<smem>>
      memref.store %33, %arg4[%c0_18, %c0_19] : memref<1x1xf32, #tpu.memory_space<smem>>
    } else {
    }
    return
  }
  func.func @transform_0(%arg0: i32, %arg1: i32) -> (i32, i32) {
    %c1_i32 = arith.constant 1 : i32
    %0 = arith.muli %arg0, %c1_i32 : i32
    %1 = arith.addi %0, %arg1 : i32
    %c0_i32 = arith.constant 0 : i32
    %c0_i32_0 = arith.constant 0 : i32
    return %1, %c0_i32 : i32, i32
  }
  func.func @transform_1(%arg0: i32, %arg1: i32) -> (i32, i32) {
    %c1_i32 = arith.constant 1 : i32
    %0 = arith.muli %arg0, %c1_i32 : i32
    %1 = arith.addi %0, %arg1 : i32
    %c0_i32 = arith.constant 0 : i32
    %c0_i32_0 = arith.constant 0 : i32
    return %1, %c0_i32 : i32, i32
  }
  func.func @transform_2(%arg0: i32, %arg1: i32) -> (i32, i32) {
    %c0_i32 = arith.constant 0 : i32
    %c0_i32_0 = arith.constant 0 : i32
    return %arg0, %c0_i32 : i32, i32
  }
}

</mosaic_0001>

<bundles_post_ra>
// kernel: tpu_custom_call.1
= control target key start
LH: loop header
LB: loop body
LE: loop exit
PB: predicated region body
PF: predicated region fallthrough
CT: control target
= control target key end

     0   :  { %7 = vsyncpa [#allocation4], 0  ;;  %s249_s0 = inlined_call_operand.hbm [shape: f32[16,128], index: 0, kind: input, shape index: {}]   ;;  %s250_s1 = inlined_call_operand.hbm [shape: f32[16,128], index: 1, kind: input, shape index: {}]   ;;  %s251_s2 = inlined_call_operand.hbm [shape: f32[1,1], index: 2, kind: output, shape index: {}]  }
   0x1   :  { %8 = vsyncpa [#allocation7], 0 }
   0x2   :  { %9 = vsyncpa [#allocation5], 0  ;;  %s193_s9 = smov [#allocation3]   ;;  %s133_s13 = scalar_lea.hbm %s249_s0, 256 }
   0x3   :  { %s19_s10 = sshll.u32 %s193_s9, 4  ;;  %p134_p0 = scmp.ne.s32.totalorder %s249_s0, %s133_s13  ;;  %s20_s10 = int_to_ptr.vmem [resolvable:$true] %s19_s10 }
   0x4   :  { %p137_p1 = scmp.lt.u32.totalorder %s133_s13, %s249_s0 }
   0x6   :  { %p139_p2 = pnand %p137_p1, %p134_p0 }
   0x8   :  { %142 = shalt.err (!%p139_p2)
}
   0x9   :  { %s143_s18 = scalar_lea.vmem %s20_s10, 256  ;;  %p148_p4 = scmp.lt.s32.totalorder %s20_s10, %s20_s10 }
   0xa   :  { %p144_p3 = scmp.ne.s32.totalorder %s20_s10, %s143_s18  ;;  %p149_p5 = scmp.lt.s32.totalorder %s143_s18, %s143_s18 }
   0xc   :  { %p150_p6 = por %p149_p5, %p148_p4 }
   0xe   :  { %p151_p7 = pnand %p150_p6, %p144_p3 }
  0x10   :  { %154 = shalt.err (!%p151_p7)
}
  0x11   :  { %s194_s19 = smov 128   ;;  %s195_s20 = smov 8  }
  0x12   :  { %25 = dma.hbm_to_vmem [thread:$0]  %s249_s0, 256, %s20_s10, [#allocation4], %s194_s19, %s194_s19, %s195_s20  }
  0x13   :  { %s196_s23 = smov [#allocation6]   ;;  %s155_s27 = scalar_lea.hbm %s250_s1, 256 }
  0x14   :  { %s35_s24 = sshll.u32 %s196_s23, 4  ;;  %p156_p8 = scmp.ne.s32.totalorder %s250_s1, %s155_s27  ;;  %s36_s24 = int_to_ptr.vmem [resolvable:$true] %s35_s24 }
  0x15   :  { %p159_p9 = scmp.lt.u32.totalorder %s155_s27, %s250_s1 }
  0x17   :  { %p161_p10 = pnand %p159_p9, %p156_p8 }
  0x19   :  { %164 = shalt.err (!%p161_p10)
}
  0x1a   :  { %s165_s4 = scalar_lea.vmem %s36_s24, 256  ;;  %p170_p12 = scmp.lt.s32.totalorder %s36_s24, %s36_s24 }
  0x1b   :  { %p166_p11 = scmp.ne.s32.totalorder %s36_s24, %s165_s4  ;;  %p171_p13 = scmp.lt.s32.totalorder %s165_s4, %s165_s4 }
  0x1d   :  { %p172_p0 = por %p171_p13, %p170_p12 }
  0x1f   :  { %p173_p1 = pnand %p172_p0, %p166_p11 }
  0x21   :  { %176 = shalt.err (!%p173_p1)
}
  0x22   :  { %41 = dma.hbm_to_vmem [thread:$0]  %s250_s1, 256, %s36_s24, [#allocation7], %s194_s19, %s194_s19, %s195_s20  }
  0x23   :  { %187 = dma.done.wait [#allocation4], 256  }
  0x24   :  { %188 = vsyncadd [#allocation4], 4294967040 }
  0x25   :  { %189 = dma.done.wait [#allocation7], 256  }
  0x26   :  { %190 = vsyncadd [#allocation7], 4294967040  ;;  %v60_v0 = vld [vmem:[#allocation3] sm:$0xff]  ;;  %v61_v1 = vld [vmem:[#allocation3 + $0x8] sm:$0xff]  ;;  %s177_s8 = scalar_lea.hbm %s251_s2, 16 }
  0x27   :  { %v62_v2 = vld [vmem:[#allocation6] sm:$0xff]  ;;  %v63_v3 = vld [vmem:[#allocation6 + $0x8] sm:$0xff]  ;;  %p178_p2 = scmp.ne.s32.totalorder %s251_s2, %s177_s8  ;;  %p181_p3 = scmp.lt.u32.totalorder %s177_s8, %s251_s2 }
  0x28   :  { %v64_v4 = vsub.f32 %v60_v0, %v62_v2  ;;  %v65_v5 = vsub.f32 %v61_v1, %v63_v3 }
  0x29   :  { %p183_p4 = pnand %p181_p3, %p178_p2 }
  0x2a   :  { %v66_v6 = vand.u32 2147483647, %v64_v4  ;;  %v67_v7 = vand.u32 2147483647, %v65_v5 }
  0x2c   :  { %v68_v8 = vmul.f32 -1.0, %v66_v6  ;;  %v69_v9 = vmul.f32 -1.0, %v67_v7  ;;  %v76_v12 = vmul.f32 %v66_v6, %v66_v6  ;;  %v77_v14 = vmul.f32 %v67_v7, %v67_v7 }
  0x2e   :  { %v70_v10 = vmul.f32 1.442695, %v68_v8  ;;  %v72_v11 = vmul.f32 1.442695, %v69_v9 }
  0x30   :  { %129 = vpow2.f32 %v70_v10 }
  0x31   :  { %131 = vpow2.f32 %v72_v11 }
  0x3a   :  { %v130_v13 = vpop.eup %129 }
  0x3b   :  { %v132_v15 = vpop.eup %131  ;;  %v74_v16 = vsub.f32 1.0, %v130_v13 }
  0x3c   :  { %v75_v17 = vsub.f32 1.0, %v132_v15 }
  0x3d   :  { %v78_v18 = vmul.f32 %v76_v12, %v74_v16 }
  0x3e   :  { %v79_v19 = vmul.f32 %v77_v14, %v75_v17 }
  0x40   :  { %v95_v20 = vadd.f32 %v79_v19, %v78_v18 }
  0x42   :  { %96 = vadd.xlane.f32.xlu0 %v95_v20 }
  0xcf   :  { %v97_v21 = vpop.xlane.xlu0 %96 }
  0xd0   :  { %v98_v22 = vrot.slane %v97_v21, 4 }
  0xd2   :  { %v99_v23 = vadd.f32 %v98_v22, %v97_v21 }
  0xd4   :  { %v100_v24 = vrot.slane %v99_v23, 2 }
  0xd6   :  { %v101_v25 = vadd.f32 %v100_v24, %v99_v23 }
  0xd8   :  { %v102_v26 = vrot.slane %v101_v25, 1 }
  0xda   :  { %v103_v27 = vadd.f32 %v102_v26, %v101_v25 }
  0xdc   :  { %122 = vpush %v103_v27 }
 0x10d   :  { %s123_s1 = spop %122 }
 0x10e   :  { %106 = sst [smem:[#allocation8]] %s123_s1 }
 0x10f   :  { %186 = shalt.err (!%p183_p4)
}
 0x110   :  { %s197_s13 = smov [#allocation8]  }
 0x111   :  { %114 = dma.smem_to_hbm %s197_s13, 16, %s251_s2, [#allocation5]  }
 0x112   :  { %191 = dma.done.wait [#allocation5], 16  }
 0x113   :  { %192 = vsyncadd [#allocation5], 4294967280 }
 0x114   :  { %118 = sfence }
 0x115   :  { %119 = vsyncpa [#allocation4], 1 }
 0x116   :  { %120 = vsyncpa [#allocation7], 1 }
 0x117   :  { %121 = vsyncpa [#allocation5], 1 }

</bundles_post_ra>
